<compile_context>
chip_gen: v5e
topology: v5e:2x2
jax: 0.10.0
libtpu: 0.0.40
codegen_flags: <defaults>
</compile_context>

<pallas_src>
import functools

import jax
import jax.numpy as jnp
from jax import lax
from jax.experimental import pallas as pl
from jax.experimental.pallas import tpu as pltpu

_INV_SQRT2 = 0.7071067811865476
_LN_EPS = 1e-5  # torch.nn.LayerNorm default


# ----------------------------------------------------------------------------
# Kernel
# ----------------------------------------------------------------------------
def _ffn_kernel(x_ref, gamma_ref, beta_ref, w1_ref, b1_ref, w2_ref, b2_ref,
                o_ref, xn_ref, *acc_scratch):
    # If no dedicated accumulator scratch was allocated (f32 output), accumulate
    # directly into the output block, which stays resident across the hidden axis.
    acc_ref = acc_scratch[0] if acc_scratch else o_ref
    j = pl.program_id(1)

    # ---- LayerNorm once per row tile (hidden axis step 0) -------------------
    @pl.when(j == 0)
    def _():
        x = x_ref[...].astype(jnp.float32)
        mean = jnp.mean(x, axis=-1, keepdims=True)
        xc = x - mean
        var = jnp.mean(xc * xc, axis=-1, keepdims=True)
        inv = lax.rsqrt(var + _LN_EPS)
        xn = (xc * inv * gamma_ref[...].astype(jnp.float32)
              + beta_ref[...].astype(jnp.float32))
        xn_ref[...] = xn.astype(xn_ref.dtype)  # cached in MXU operand dtype

    # ---- Linear(dim -> th chunk of n_hidden), native-dtype MXU operands -----
    h = jnp.dot(xn_ref[...], w1_ref[...], preferred_element_type=jnp.float32)
    h = h + b1_ref[...].astype(jnp.float32)

    # ---- GELU (exact, erf-based; matches torch.nn.GELU default) -------------
    h = 0.5 * h * (1.0 + lax.erf(h * _INV_SQRT2))

    # ---- Linear(th chunk -> dim), accumulate over hidden chunks -------------
    part = jnp.dot(h.astype(w2_ref.dtype), w2_ref[...],
                   preferred_element_type=jnp.float32)

    @pl.when(j == 0)
    def _():
        acc_ref[...] = part.astype(acc_ref.dtype)      # no zero-init pass

    @pl.when(j > 0)
    def _():
        acc_ref[...] = acc_ref[...] + part.astype(acc_ref.dtype)

    # ---- finalize: add output bias and write ---------------------------------
    @pl.when(j == pl.num_programs(1) - 1)
    def _():
        o_ref[...] = (acc_ref[...].astype(jnp.float32)
                      + b2_ref[...].astype(jnp.float32)).astype(o_ref.dtype)


# ----------------------------------------------------------------------------
# Tile / VMEM budgeting helpers
# ----------------------------------------------------------------------------
def _round_up(x, m):
    return (x + m - 1) // m * m


def _vmem_budget_bytes():
    """Generation-aware VMEM budget: physical capacity minus headroom."""
    cap = 64 << 20  # conservative fallback (v7x per-TensorCore VMEM)
    try:
        info = pltpu.get_tpu_info()
        cap = int(getattr(info, "vmem_capacity_bytes", cap))
    except Exception:
        pass
    headroom = 16 << 20  # compiler internal scratch / semaphores
    return max(32 << 20, cap - headroom)


def _sublane_pack(*dtypes):
    """Native sublane packing for the narrowest relevant dtype."""
    pack = 8
    for dt in dtypes:
        size = jnp.dtype(dt).itemsize
        pack = max(pack, {4: 8, 2: 16, 1: 32}.get(size, 8))
    return pack


def _tm_candidates(tm_desired, n_rows, pack):
    top = max(pack, min(_round_up(tm_desired, pack), _round_up(n_rows, pack)))
    cands = []
    t = top
    while True:
        if not cands or t != cands[-1]:
            cands.append(t)
        if t <= pack:
            break
        t = max(pack, _round_up(t // 2, pack))
    return cands


def _th_candidates(th_desired, n_hidden_p):
    cands = []
    for c in (th_desired, 2048, 1024, 512, 256, 128):
        c = int(c)
        if (128 <= c <= n_hidden_p and n_hidden_p % c == 0
                and c % 128 == 0 and c not in cands):
            cands.append(c)
    if not cands:
        cands = [128 if n_hidden_p % 128 == 0 else n_hidden_p]
    return sorted(cands, reverse=True)


def _vmem_estimate(tm, th, dim, xs, ws, os_, acc_in_out):
    """Double-buffered pipelined operands + single-copy scratch."""
    est = 2 * (tm * dim * xs        # x tile
               + dim * th * ws      # W1 block
               + th * 4             # b1 block
               + th * dim * ws      # W2 block
               + 3 * dim * 4        # gamma, beta, b2
               + tm * dim * os_)    # out tile
    est += tm * dim * ws            # cached LayerNorm(x) scratch
    if not acc_in_out:
        est += tm * dim * 4         # dedicated f32 accumulator
    return est


def _choose_tiles(n_rows, dim, n_hidden_p, xs, ws, os_, pack, budget,
                  tm_desired, th_desired, acc_in_out):
    tm_cands = _tm_candidates(tm_desired, n_rows, pack)
    th_stream = _th_candidates(th_desired, n_hidden_p)
    for tm in tm_cands:
        # Weights-resident fast path first (DMA W1/W2 exactly once), then stream.
        th_options = [n_hidden_p] + [t for t in th_stream if t != n_hidden_p]
        for th in th_options:
            if _vmem_estimate(tm, th, dim, xs, ws, os_, acc_in_out) <= budget:
                return tm, th
    return tm_cands[-1], th_stream[-1]  # best effort; smallest tiles


# ----------------------------------------------------------------------------
# Wrapper
# ----------------------------------------------------------------------------
@functools.partial(jax.jit, static_argnames=("tm", "th", "mxu_dtype"))
def ffn_pallas(x, gamma, beta, w1, b1, w2, b2, *, tm=512, th=512, mxu_dtype=None):
    """x: (batch, seq, dim) -> (batch, seq, dim)."""
    batch, seq, dim = x.shape
    n_hidden = w1.shape[1]
    n_rows = batch * seq

    compute_dtype = (jnp.dtype(mxu_dtype) if mxu_dtype is not None
                     else jnp.dtype(w1.dtype))
    out_dtype = jnp.dtype(x.dtype)
    acc_in_out = out_dtype == jnp.dtype(jnp.float32)

    xs = jnp.dtype(x.dtype).itemsize
    ws = compute_dtype.itemsize
    os_ = out_dtype.itemsize
    pack = _sublane_pack(x.dtype, compute_dtype, out_dtype)

    # Hidden dim padded to a multiple of 128 so th tiles stay MXU/lane friendly
    # and odd hidden sizes never force a huge double-buffered fallback block.
    n_hidden_p = _round_up(n_hidden, 128)

    budget = _vmem_budget_bytes()
    tm_eff, th_eff = _choose_tiles(n_rows, dim, n_hidden_p, xs, ws, os_, pack,
                                   budget, tm, th, acc_in_out)

    n_rows_p = _round_up(n_rows, tm_eff)
    # Keep >= 2 steps on the "parallel" row axis (megacore) when weights are
    # resident -- splitting then costs no extra weight HBM traffic.
    if th_eff == n_hidden_p and n_rows_p // tm_eff < 2 and tm_eff >= 2 * pack:
        tm_eff = _round_up(tm_eff // 2, pack)
        n_rows_p = _round_up(n_rows, tm_eff)

    grid = (n_rows_p // tm_eff, n_hidden_p // th_eff)

    # ---- operand preparation -------------------------------------------------
    x2 = x.reshape(n_rows, dim)
    if n_rows_p != n_rows:
        x2 = jnp.pad(x2, ((0, n_rows_p - n_rows), (0, 0)))

    w1c = w1.astype(compute_dtype)
    w2c = w2.astype(compute_dtype)
    b1p = b1
    if n_hidden_p != n_hidden:
        w1c = jnp.pad(w1c, ((0, 0), (0, n_hidden_p - n_hidden)))
        w2c = jnp.pad(w2c, ((0, n_hidden_p - n_hidden), (0, 0)))
        b1p = jnp.pad(b1, ((0, n_hidden_p - n_hidden),))

    gamma2 = gamma.reshape(1, dim)
    beta2 = beta.reshape(1, dim)
    b1_2 = b1p.reshape(1, n_hidden_p)
    b2_2 = b2.reshape(1, dim)

    # ---- cost estimate: weights re-stream once per row tile unless resident ---
    n_row_tiles = grid[0]
    weight_passes = 1 if grid[1] == 1 else n_row_tiles
    w_bytes = (w1c.size + w2c.size) * ws
    cost = pl.CostEstimate(
        flops=4 * n_rows_p * dim * n_hidden_p,
        transcendentals=n_rows_p * n_hidden_p,
        bytes_accessed=int(n_rows_p * dim * (xs + os_)
                           + weight_passes * w_bytes
                           + n_hidden_p * jnp.dtype(b1p.dtype).itemsize
                           + 3 * dim * 4),
    )

    scratch_shapes = [pltpu.VMEM((tm_eff, dim), compute_dtype)]  # cached LN(x)
    if not acc_in_out:
        scratch_shapes.append(pltpu.VMEM((tm_eff, dim), jnp.float32))

    out = pl.pallas_call(
        _ffn_kernel,
        out_shape=jax.ShapeDtypeStruct((n_rows_p, dim), out_dtype),
        grid_spec=pltpu.PrefetchScalarGridSpec(
            num_scalar_prefetch=0,
            grid=grid,
            in_specs=[
                pl.BlockSpec((tm_eff, dim), lambda i, j: (i, 0)),    # x rows
                pl.BlockSpec((1, dim), lambda i, j: (0, 0)),         # LN gamma
                pl.BlockSpec((1, dim), lambda i, j: (0, 0)),         # LN beta
                pl.BlockSpec((dim, th_eff), lambda i, j: (0, j)),    # W1 block
                pl.BlockSpec((1, th_eff), lambda i, j: (0, j)),      # b1 block
                pl.BlockSpec((th_eff, dim), lambda i, j: (j, 0)),    # W2 block
                pl.BlockSpec((1, dim), lambda i, j: (0, 0)),         # b2
            ],
            out_specs=pl.BlockSpec((tm_eff, dim), lambda i, j: (i, 0)),
            scratch_shapes=scratch_shapes,
        ),
        compiler_params=pltpu.CompilerParams(
            dimension_semantics=("parallel", "arbitrary"),
            vmem_limit_bytes=int(budget),
        ),
        cost_estimate=cost,
    )(x2, gamma2, beta2, w1c, b1_2, w2c, b2_2)

    return out[:n_rows].reshape(batch, seq, dim)


# ----------------------------------------------------------------------------
# Pure-JAX reference mirroring the PyTorch module
# ----------------------------------------------------------------------------
def ffn_reference(x, gamma, beta, w1, b1, w2, b2):
    xf = x.astype(jnp.float32)
    mean = jnp.mean(xf, axis=-1, keepdims=True)
    var = jnp.mean((xf - mean) ** 2, axis=-1, keepdims=True)
    xn = (xf - mean) * lax.rsqrt(var + _LN_EPS) * gamma + beta
    h = xn @ w1 + b1
    h = 0.5 * h * (1.0 + lax.erf(h * _INV_SQRT2))
    y = h @ w2 + b2
    return y.astype(x.dtype)


if __name__ == "__main__":
    # Small shapes consistent with the module: x of shape (batch, seq, dim).
    batch, seq, dim, n_hidden = 2, 8, 128, 256
    key = jax.random.PRNGKey(0)
    kx, kw1, kb1, kw2, kb2 = jax.random.split(key, 5)

    x = jax.random.normal(kx, (batch, seq, dim), dtype=jnp.float32)

    # LayerNorm: ones/zeros; Linears: uniform with bound 1/sqrt(fan_in).
    gamma = jnp.ones((dim,), jnp.float32)
    beta = jnp.zeros((dim,), jnp.float32)
    bound1 = dim ** -0.5
    w1 = jax.random.uniform(kw1, (dim, n_hidden), jnp.float32, -bound1, bound1)
    b1 = jax.random.uniform(kb1, (n_hidden,), jnp.float32, -bound1, bound1)
    bound2 = n_hidden ** -0.5
    w2 = jax.random.uniform(kw2, (n_hidden, dim), jnp.float32, -bound2, bound2)
    b2 = jax.random.uniform(kb2, (dim,), jnp.float32, -bound2, bound2)

    ref = ffn_reference(x, gamma, beta, w1, b1, w2, b2)

    # 1) exact (native f32 MXU operand) path.
    out = jax.block_until_ready(ffn_pallas(x, gamma, beta, w1, b1, w2, b2))
    assert out.shape == (batch, seq, dim)
    assert jnp.allclose(out, ref, atol=1e-4, rtol=1e-4), "f32 mismatch vs reference"

    # 2) bf16 MXU-operand path (f32 accumulation) -- looser tolerance.
    out_bf16 = jax.block_until_ready(
        ffn_pallas(x, gamma, beta, w1, b1, w2, b2, mxu_dtype=jnp.bfloat16))
    assert bool(jnp.all(jnp.isfinite(out_bf16)))
    assert jnp.allclose(out_bf16, ref, atol=1e-1, rtol=1e-1), "bf16 mismatch vs reference"

    # 3) padding paths: rows not a multiple of 8, hidden not a multiple of 128.
    batch2, seq2, dim2, hid2 = 1, 5, 128, 200
    kx2, kw3, kb3, kw4, kb4 = jax.random.split(jax.random.PRNGKey(1), 5)
    x_b = jax.random.normal(kx2, (batch2, seq2, dim2), dtype=jnp.float32)
    g_b = jnp.ones((dim2,), jnp.float32)
    be_b = jnp.zeros((dim2,), jnp.float32)
    w1_b = jax.random.uniform(kw3, (dim2, hid2), jnp.float32, -0.1, 0.1)
    b1_b = jax.random.uniform(kb3, (hid2,), jnp.float32, -0.1, 0.1)
    w2_b = jax.random.uniform(kw4, (hid2, dim2), jnp.float32, -0.1, 0.1)
    b2_b = jax.random.uniform(kb4, (dim2,), jnp.float32, -0.1, 0.1)
    out_b = jax.block_until_ready(
        ffn_pallas(x_b, g_b, be_b, w1_b, b1_b, w2_b, b2_b))
    ref_b = ffn_reference(x_b, g_b, be_b, w1_b, b1_b, w2_b, b2_b)
    assert jnp.allclose(out_b, ref_b, atol=1e-4, rtol=1e-4), "padded mismatch vs reference"

    print("KERNEL_OK")
</pallas_src>

<mosaic_0001>
module attributes {stable_mosaic.version = 11 : i64} {
  func.func @_ffn_kernel(%arg0: i32, %arg1: i32, %arg2: memref<8x128xf32, #tpu.memory_space<vmem>>, %arg3: memref<1x128xf32, #tpu.memory_space<vmem>>, %arg4: memref<1x128xf32, #tpu.memory_space<vmem>>, %arg5: memref<128x256xf32, #tpu.memory_space<vmem>>, %arg6: memref<1x256xf32, #tpu.memory_space<vmem>>, %arg7: memref<256x128xf32, #tpu.memory_space<vmem>>, %arg8: memref<1x128xf32, #tpu.memory_space<vmem>>, %arg9: memref<8x128xf32, #tpu.memory_space<vmem>>, %arg10: memref<8x128xf32, #tpu.memory_space<vmem>>) attributes {dimension_semantics = [#tpu.dimension_semantics<parallel>, #tpu.dimension_semantics<arbitrary>], iteration_bounds = array<i64: 2, 1>, scalar_prefetch = 0 : i64, scratch_operands = 1 : i64, tpu.core_type = #tpu.core_type<tc>, window_params = [{transform_indices = @transform_0, window_bounds = array<i64: 8, 128>}, {pipeline_mode = #tpu.pipeline_mode<synchronous>, transform_indices = @transform_1, window_bounds = array<i64: 1, 128>}, {pipeline_mode = #tpu.pipeline_mode<synchronous>, transform_indices = @transform_2, window_bounds = array<i64: 1, 128>}, {transform_indices = @transform_3, window_bounds = array<i64: 128, 256>}, {transform_indices = @transform_4, window_bounds = array<i64: 1, 256>}, {transform_indices = @transform_5, window_bounds = array<i64: 256, 128>}, {pipeline_mode = #tpu.pipeline_mode<synchronous>, transform_indices = @transform_6, window_bounds = array<i64: 1, 128>}, {transform_indices = @transform_7, window_bounds = array<i64: 8, 128>}]} {
    %c0_i32 = arith.constant 0 : i32
    %0 = arith.cmpi eq, %arg1, %c0_i32 : i32
    %1 = arith.extui %0 : i1 to i32
    %c0_i32_0 = arith.constant 0 : i32
    %2 = arith.cmpi ne, %1, %c0_i32_0 : i32
    scf.if %2 {
      %c0_18 = arith.constant 0 : index
      %c0_19 = arith.constant 0 : index
      %28 = vector.load %arg2[%c0_18, %c0_19] : memref<8x128xf32, #tpu.memory_space<vmem>>, vector<8x128xf32>
      %cst_20 = arith.constant dense<0.000000e+00> : vector<8xf32>
      %29 = vector.multi_reduction <add>, %28, %cst_20 [1] : vector<8x128xf32> to vector<8xf32>
      %30 = vector.shape_cast %29 : vector<8xf32> to vector<8x1xf32>
      %cst_21 = arith.constant 1.280000e+02 : f32
      %31 = vector.broadcast %cst_21 : f32 to vector<8x1xf32>
      %32 = arith.divf %30, %31 : vector<8x1xf32>
      %33 = vector.broadcast %32 : vector<8x1xf32> to vector<8x128xf32>
      %34 = arith.subf %28, %33 : vector<8x128xf32>
      %35 = arith.mulf %34, %34 : vector<8x128xf32>
      %cst_22 = arith.constant dense<0.000000e+00> : vector<8xf32>
      %36 = vector.multi_reduction <add>, %35, %cst_22 [1] : vector<8x128xf32> to vector<8xf32>
      %37 = vector.shape_cast %36 : vector<8xf32> to vector<8x1xf32>
      %cst_23 = arith.constant 1.280000e+02 : f32
      %38 = vector.broadcast %cst_23 : f32 to vector<8x1xf32>
      %39 = arith.divf %37, %38 : vector<8x1xf32>
      %cst_24 = arith.constant 9.99999974E-6 : f32
      %40 = vector.broadcast %cst_24 : f32 to vector<8x1xf32>
      %41 = arith.addf %39, %40 : vector<8x1xf32>
      %42 = math.rsqrt %41 : vector<8x1xf32>
      %43 = vector.broadcast %42 : vector<8x1xf32> to vector<8x128xf32>
      %44 = arith.mulf %34, %43 : vector<8x128xf32>
      %c0_25 = arith.constant 0 : index
      %c0_26 = arith.constant 0 : index
      %45 = vector.load %arg3[%c0_25, %c0_26] : memref<1x128xf32, #tpu.memory_space<vmem>>, vector<1x128xf32>
      %46 = vector.broadcast %45 : vector<1x128xf32> to vector<8x128xf32>
      %47 = arith.mulf %44, %46 : vector<8x128xf32>
      %c0_27 = arith.constant 0 : index
      %c0_28 = arith.constant 0 : index
      %48 = vector.load %arg4[%c0_27, %c0_28] : memref<1x128xf32, #tpu.memory_space<vmem>>, vector<1x128xf32>
      %49 = vector.broadcast %48 : vector<1x128xf32> to vector<8x128xf32>
      %50 = arith.addf %47, %49 : vector<8x128xf32>
      %c0_29 = arith.constant 0 : index
      %c0_30 = arith.constant 0 : index
      %51 = vector.load %arg10[%c0_29, %c0_30] : memref<8x128xf32, #tpu.memory_space<vmem>>, vector<8x128xf32>
      tpu.vector_store %arg10[%c0_29, %c0_30], %50 {strides = array<i32>} : memref<8x128xf32, #tpu.memory_space<vmem>>, vector<8x128xf32>,
    } else {
    }
    %c0 = arith.constant 0 : index
    %c0_1 = arith.constant 0 : index
    %3 = vector.load %arg10[%c0, %c0_1] : memref<8x128xf32, #tpu.memory_space<vmem>>, vector<8x128xf32>
    %c0_2 = arith.constant 0 : index
    %c0_3 = arith.constant 0 : index
    %4 = vector.load %arg5[%c0_2, %c0_3] : memref<128x256xf32, #tpu.memory_space<vmem>>, vector<128x256xf32>
    %cst = arith.constant dense<0.000000e+00> : vector<8x256xf32>
    %5 = tpu.matmul %3, %4, %cst {dimension_numbers = #tpu.dot_dimension_numbers<[1], [0], [0], [1], [0, 0, 1, 1], [], []>} : vector<8x128xf32>, vector<128x256xf32>, vector<8x256xf32> -> vector<8x256xf32>
    %c0_4 = arith.constant 0 : index
    %c0_5 = arith.constant 0 : index
    %6 = vector.load %arg6[%c0_4, %c0_5] : memref<1x256xf32, #tpu.memory_space<vmem>>, vector<1x256xf32>
    %7 = vector.broadcast %6 : vector<1x256xf32> to vector<8x256xf32>
    %8 = arith.addf %5, %7 : vector<8x256xf32>
    %cst_6 = arith.constant 5.000000e-01 : f32
    %9 = vector.broadcast %cst_6 : f32 to vector<8x256xf32>
    %10 = arith.mulf %9, %8 : vector<8x256xf32>
    %cst_7 = arith.constant 0.707106769 : f32
    %11 = vector.broadcast %cst_7 : f32 to vector<8x256xf32>
    %12 = arith.mulf %8, %11 : vector<8x256xf32>
    %13 = math.erf %12 : vector<8x256xf32>
    %cst_8 = arith.constant 1.000000e+00 : f32
    %14 = vector.broadcast %cst_8 : f32 to vector<8x256xf32>
    %15 = arith.addf %14, %13 : vector<8x256xf32>
    %16 = arith.mulf %10, %15 : vector<8x256xf32>
    %c0_9 = arith.constant 0 : index
    %c0_10 = arith.constant 0 : index
    %17 = vector.load %arg7[%c0_9, %c0_10] : memref<256x128xf32, #tpu.memory_space<vmem>>, vector<256x128xf32>
    %cst_11 = arith.constant dense<0.000000e+00> : vector<8x128xf32>
    %18 = tpu.matmul %16, %17, %cst_11 {dimension_numbers = #tpu.dot_dimension_numbers<[1], [0], [0], [1], [0, 0, 1, 1], [], []>} : vector<8x256xf32>, vector<256x128xf32>, vector<8x128xf32> -> vector<8x128xf32>
    %c0_i32_12 = arith.constant 0 : i32
    %19 = arith.cmpi eq, %arg1, %c0_i32_12 : i32
    %20 = arith.extui %19 : i1 to i32
    %c0_i32_13 = arith.constant 0 : i32
    %21 = arith.cmpi ne, %20, %c0_i32_13 : i32
    scf.if %21 {
      %c0_18 = arith.constant 0 : index
      %c0_19 = arith.constant 0 : index
      %28 = vector.load %arg9[%c0_18, %c0_19] : memref<8x128xf32, #tpu.memory_space<vmem>>, vector<8x128xf32>
      tpu.vector_store %arg9[%c0_18, %c0_19], %18 {strides = array<i32>} : memref<8x128xf32, #tpu.memory_space<vmem>>, vector<8x128xf32>,
    } else {
    }
    %c0_i32_14 = arith.constant 0 : i32
    %22 = arith.cmpi sgt, %arg1, %c0_i32_14 : i32
    %23 = arith.extui %22 : i1 to i32
    %c0_i32_15 = arith.constant 0 : i32
    %24 = arith.cmpi ne, %23, %c0_i32_15 : i32
    scf.if %24 {
      %c0_18 = arith.constant 0 : index
      %c0_19 = arith.constant 0 : index
      %28 = vector.load %arg9[%c0_18, %c0_19] : memref<8x128xf32, #tpu.memory_space<vmem>>, vector<8x128xf32>
      %29 = arith.addf %28, %18 : vector<8x128xf32>
      %c0_20 = arith.constant 0 : index
      %c0_21 = arith.constant 0 : index
      %30 = vector.load %arg9[%c0_20, %c0_21] : memref<8x128xf32, #tpu.memory_space<vmem>>, vector<8x128xf32>
      tpu.vector_store %arg9[%c0_20, %c0_21], %29 {strides = array<i32>} : memref<8x128xf32, #tpu.memory_space<vmem>>, vector<8x128xf32>,
    } else {
    }
    %c0_i32_16 = arith.constant 0 : i32
    %25 = arith.cmpi eq, %arg1, %c0_i32_16 : i32
    %26 = arith.extui %25 : i1 to i32
    %c0_i32_17 = arith.constant 0 : i32
    %27 = arith.cmpi ne, %26, %c0_i32_17 : i32
    scf.if %27 {
      %c0_18 = arith.constant 0 : index
      %c0_19 = arith.constant 0 : index
      %28 = vector.load %arg9[%c0_18, %c0_19] : memref<8x128xf32, #tpu.memory_space<vmem>>, vector<8x128xf32>
      %c0_20 = arith.constant 0 : index
      %c0_21 = arith.constant 0 : index
      %29 = vector.load %arg8[%c0_20, %c0_21] : memref<1x128xf32, #tpu.memory_space<vmem>>, vector<1x128xf32>
      %30 = vector.broadcast %29 : vector<1x128xf32> to vector<8x128xf32>
      %31 = arith.addf %28, %30 : vector<8x128xf32>
      %c0_22 = arith.constant 0 : index
      %c0_23 = arith.constant 0 : index
      %32 = vector.load %arg9[%c0_22, %c0_23] : memref<8x128xf32, #tpu.memory_space<vmem>>, vector<8x128xf32>
      tpu.vector_store %arg9[%c0_22, %c0_23], %31 {strides = array<i32>} : memref<8x128xf32, #tpu.memory_space<vmem>>, vector<8x128xf32>,
    } else {
    }
    return
  }
  func.func @transform_0(%arg0: i32, %arg1: i32) -> (i32, i32) {
    %c0_i32 = arith.constant 0 : i32
    %c0_i32_0 = arith.constant 0 : i32
    return %arg0, %c0_i32 : i32, i32
  }
  func.func @transform_1(%arg0: i32, %arg1: i32) -> (i32, i32) {
    %c0_i32 = arith.constant 0 : i32
    %c0_i32_0 = arith.constant 0 : i32
    %c0_i32_1 = arith.constant 0 : i32
    return %c0_i32, %c0_i32_0 : i32, i32
  }
  func.func @transform_2(%arg0: i32, %arg1: i32) -> (i32, i32) {
    %c0_i32 = arith.constant 0 : i32
    %c0_i32_0 = arith.constant 0 : i32
    %c0_i32_1 = arith.constant 0 : i32
    return %c0_i32, %c0_i32_0 : i32, i32
  }
  func.func @transform_3(%arg0: i32, %arg1: i32) -> (i32, i32) {
    %c0_i32 = arith.constant 0 : i32
    %c0_i32_0 = arith.constant 0 : i32
    return %c0_i32, %arg1 : i32, i32
  }
  func.func @transform_4(%arg0: i32, %arg1: i32) -> (i32, i32) {
    %c0_i32 = arith.constant 0 : i32
    %c0_i32_0 = arith.constant 0 : i32
    return %c0_i32, %arg1 : i32, i32
  }
  func.func @transform_5(%arg0: i32, %arg1: i32) -> (i32, i32) {
    %c0_i32 = arith.constant 0 : i32
    %c0_i32_0 = arith.constant 0 : i32
    return %arg1, %c0_i32 : i32, i32
  }
  func.func @transform_6(%arg0: i32, %arg1: i32) -> (i32, i32) {
    %c0_i32 = arith.constant 0 : i32
    %c0_i32_0 = arith.constant 0 : i32
    %c0_i32_1 = arith.constant 0 : i32
    return %c0_i32, %c0_i32_0 : i32, i32
  }
  func.func @transform_7(%arg0: i32, %arg1: i32) -> (i32, i32) {
    %c0_i32 = arith.constant 0 : i32
    %c0_i32_0 = arith.constant 0 : i32
    return %arg0, %c0_i32 : i32, i32
  }
}

</mosaic_0001>

<bundles_post_ra>
// kernel: ffn_pallas.1
= control target key start
LH: loop header
LB: loop body
LE: loop exit
PB: predicated region body
PF: predicated region fallthrough
CT: control target
= control target key end

     0   :  { %s1365_s0 = inlined_call_operand.hbm [shape: f32[16,128], index: 0, kind: input, shape index: {}]   ;;  %s1366_s1 = inlined_call_operand.vmem [shape: f32[1,128], index: 1, kind: input, shape index: {}]   ;;  %s1367_s2 = inlined_call_operand.vmem [shape: f32[1,128], index: 2, kind: input, shape index: {}]   ;;  %s1368_s3 = inlined_call_operand.hbm [shape: f32[128,256], index: 3, kind: input, shape index: {}]   ;;  %s1369_s4 = inlined_call_operand.vmem [shape: f32[1,256], index: 4, kind: input, shape index: {}]   ;;  %s1370_s5 = inlined_call_operand.hbm [shape: f32[256,128], index: 5, kind: input, shape index: {}]   ;;  %s1371_s6 = inlined_call_operand.vmem [shape: f32[1,128], index: 6, kind: input, shape index: {}]   ;;  %s1372_s7 = inlined_call_operand.hbm [shape: f32[16,128], index: 7, kind: output, shape index: {}]  }
   0x1   :  { %1373 = sst [smem:[#allocation13_spill]] %s1368_s3 }
   0x2   :  { %12 = vsyncpa [#allocation4], 0 }
   0x3   :  { %14 = vsyncpa [#allocation4 + $0x1], 0 }
   0x4   :  { %15 = vsyncpa [#allocation7], 0 }
   0x5   :  { %16 = vsyncpa [#allocation5], 0 }
   0x6   :  { %18 = vsyncpa [#allocation5 + $0x1], 0  ;;  %s1154_s24 = smov 0   ;;  %s1156_s25 = smov 0  }
   0x7   :  { %s1158_s26 = smov 0   ;;  %s1160_s27 = smov 0  }
   0x8   :  { %s1162_s28 = smov 0   ;;  %s1164_s29 = smov 0  }
   0x9 LB: > { %s810_s30 = sadd.s32 4294967295, %s1105_s29   ;;  %p812_p0 = scmp.ge.s32.totalorder %s1105_s29, 1  ;;  %s1105_s29 = sphi %s1164_s29, %s24_s29   ;;  %s1101_s28 = sphi %s1162_s28, %s1384_s28   ;;  %s1097_s27 = sphi %s1160_s27, %s1383_s27   ;;  %s1093_s26 = sphi %s1158_s26, %s1382_s26   ;;  %s1089_s25 = sphi %s1156_s25, %s1381_s25   ;;  %s1085_s24 = sphi %s1154_s24, %s1380_s24  }
   0xa   : > { %p1188_p1 = scmp.eq.s32.totalorder %s810_s30, 0  ;;  %p234_p2 = scmp.lt.s32.totalorder %s1105_s29, 3 }
   0xb   : > { %s1375_s3 = sld [smem:[#allocation13_spill]]  ;;  %s1107_s13 = smov [#allocation6]  }
   0xc   : > { %p1196_p3 = pnand %p812_p0, %p234_p2  ;;  %s256_s14 = sshll.u32 %s1107_s13, 4  ;;  %s257_s14 = int_to_ptr.vmem [resolvable:$true] %s256_s14 }
   0xd   : > { %p816_p6 = scmp.ge.s32.totalorder %s1105_s29, 2  ;;  %s279_s17 = sshll.u32 %s1370_s5, 4  ;;  %s280_s17 = int_to_ptr.hbm [resolvable:$true] %s279_s17 }
   0xe   : > { %p842_p4 = pneg %p1196_p3  ;;  %s1108_s18 = smov 256  }
   0xf   : > { %s1109_s19 = smov 16   ;;  %s1110_s20 = smov [#allocation8]  }
  0x10   : > { %p843_p5 = pnand %p842_p4, %p1188_p1  ;;  %s281_s21 = sshll.u32 %s1110_s20, 4  ;;  %s282_s21 = int_to_ptr.vmem [resolvable:$true] %s281_s21 }
  0x11   : > { %s254_s11 = sshll.u32 %s1375_s3, 4  ;;  %s1111_s22 = smov 128   ;;  %s255_s11 = int_to_ptr.hbm [resolvable:$true] %s254_s11 }
  0x12   : > { %845 = dma.hbm_to_vmem [thread:$0]  (!%p843_p5), %s255_s11, 4096, %s257_s14, [#allocation7], %s1108_s18, %s1108_s18, %s1109_s19  }
  0x13   : > { %s1112_s23 = smov 8   ;;  %s36_s9 = sadd.s32 1, %s1101_s28 }
  0x14   : > { %848 = dma.hbm_to_vmem [thread:$0]  (!%p843_p5), %s280_s17, 4096, %s282_s21, [#allocation7], %s1111_s22, %s1111_s22, %s1112_s23  }
  0x15   : > { %s811_s10 = sadd.s32 4294967294, %s1105_s29   ;;  %p38_p7 = scmp.ge.s32.totalorder %s36_s9, 2 }
  0x16   : > { %s43_s13 = sadd.s32 1, %s1093_s26  ;;  %p50_p8 = scmp.ne.s32.totalorder %s1093_s26, %s1089_s25 }
  0x17   : > { %s1386_s9 = smov (%p38_p7, %s36_s9), 0  ;;  %p51_p9 = scmp.eq.s32.totalorder %s1105_s29, 0 }
  0x18   : > { %p56_p10 = scmp.ne.s32.totalorder %s1089_s25, %s1085_s24  ;;  %s40_s11 = ssub.s32 %s1101_s28, %s1386_s9 }
  0x19   : > { %p221_p11 = scmp.eq.s32.totalorder %s810_s30, 1  ;;  %p41_p12 = scmp.eq.s32.totalorder %s40_s11, 0 }
  0x1a   : > { %p1224_p13 = por %p1188_p1, %p56_p10  ;;  %p227_p2 = scmp.eq.s32.totalorder %s811_s10, 1 }
  0x1b   : > { %p1228_p0 = por %p221_p11, %p50_p8  ;;  %p52_p4 = por %p51_p9, %p50_p8 }
  0x1c   : > { %s1233_s16 = scalar_select %p41_p12, %s1093_s26, %s43_s13  }
  0x1d   : > { %p1235_p5 = por %p227_p2, %p56_p10  ;;  %s298_s18 = sand.u32 1, %s1093_s26  }
  0x1e   : > { %s818_s30 = sshll.u32 %s1101_s28, 3  ;;  %p859_p7 = scmp.lt.s32.totalorder %s1105_s29, 2 }
  0x1f   : > { %s817_s19 = sshll.u32 %s298_s18, 3  ;;  %s306_s22 = scalar_lea.hbm %s1365_s0, %s818_s30 }
  0x20   : > { %s308_s23 = sshll.u32 %s306_s22, 4  ;;  %s302_s11 = scalar_lea.vmem [#allocation3], %s817_s19  ;;  %s309_s23 = int_to_ptr.hbm [resolvable:$true] %s308_s23 }
  0x21   : > { %s310_s3 = sshll.u32 %s302_s11, 4  ;;  %p850_p11 = pnand %p859_p7, %p52_p4  ;;  %s311_s3 = int_to_ptr.vmem [resolvable:$true] %s310_s3 }
  0x22   : > { %s299_s10 = scalar_lea.sflag [#allocation4], %s298_s18  ;;  %319 = sbr.rel (%p1196_p3) target bundleno = 628 (0x274), region = 48 }
  0x23   : > { %852 = dma.hbm_to_vmem [thread:$0]  (!%p850_p11), %s309_s23, 128, %s311_s3, %s299_s10  }
  0x24   : > { %s1248_s13 = sand.u32 (!%p1196_p3), 1, %s1089_s25  }
  0x25   : > { %s820_s20 = sshll.u32 (!%p1196_p3), %s1248_s13, 3  ;;  %s322_s30 = scalar_lea.sflag (!%p1196_p3), [#allocation4], %s1248_s13 }
  0x26   : > { %s325_s19 = scalar_lea.vmem (!%p1196_p3), [#allocation3], %s820_s20 }
  0x27   : > { %1072 = dma.done.wait (%p1224_p13), %s322_s30, 128  }
  0x28   : > { %1074 = vsyncadd (%p1224_p13), %s322_s30, 4294967168 }
  0x29   : > { %1076 = dma.done.wait (%p1188_p1), [#allocation7], 8192  }
  0x2a   : > { %1078 = vsyncadd (%p1188_p1), [#allocation7], 4294959104  ;;  %v382_v0 = vld [vmem:[%s325_s19] sm:$0xff]  ;;  %v1113_v1 = vmov 128.0   ;;  %v450_v4 = vld [vmem:[#allocation6 + $0xe0] sm:$0xff]  ;;  %s827_s22 = sshll.u32 %s1097_s27, 3 }
  0x2b   : > { %383 = vadd.xlane.f32.xlu0 %v382_v0  ;;  %921 = vrcp.f32 %v1113_v1  ;;  %v452_v2 = vld [vmem:[#allocation6 + $0xf0] sm:$0xff]  ;;  %v453_v3 = vld [vmem:[#allocation6 + $0xf8] sm:$0xff]  ;;  %v451_v5 = vld [vmem:[#allocation6 + $0xe8] sm:$0xff]  ;;  %s692_s10 = scalar_lea.hbm %s1372_s7, %s827_s22  ;;  %s370_s3 = scalar_lea.vmem [#allocation9], %s820_s20 }
  0x2c   : > { %460 = vmatpush.msra.mxu0 %v452_v2  ;;  %480 = vmatpush.msra.mxu1 %v453_v3  ;;  %v448_v16 = vld [vmem:[#allocation6 + $0xd0] sm:$0xff]  ;;  %v449_v17 = vld [vmem:[#allocation6 + $0xd8] sm:$0xff]  ;;  %v446_v18 = vld [vmem:[#allocation6 + $0xc0] sm:$0xff]  ;;  %s694_s8 = sshll.u32 %s370_s3, 4  ;;  %s696_s12 = sshll.u32 %s692_s10, 4  ;;  %s695_s8 = int_to_ptr.vmem [resolvable:$true] %s694_s8  ;;  %s697_s12 = int_to_ptr.hbm [resolvable:$true] %s696_s12 }
  0x2d   : > { %v447_v19 = vld [vmem:[#allocation6 + $0xc8] sm:$0xff]  ;;  %v444_v20 = vld [vmem:[#allocation6 + $0xb0] sm:$0xff]  ;;  %v445_v21 = vld [vmem:[#allocation6 + $0xb8] sm:$0xff]  ;;  %s682_s27 = scalar_lea.sflag [#allocation5], %s1248_s13  ;;  %s1033_s14 = sshra.s32 %s697_s12, 4  ;;  %s1034_s14 = int_to_ptr.hbm [resolvable:$true] %s1033_s14 }
  0x2e   : > { %461 = vmatpush.msra.mxu0 %v450_v4  ;;  %481 = vmatpush.msra.mxu1 %v451_v5  ;;  %v442_v22 = vld [vmem:[#allocation6 + $0xa0] sm:$0xff]  ;;  %v443_v23 = vld [vmem:[#allocation6 + $0xa8] sm:$0xff]  ;;  %v440_v24 = vld [vmem:[#allocation6 + $0x90] sm:$0xff]  ;;  %s1035_s18 = scalar_lea.hbm %s1034_s14, 8  ;;  %s1039_s23 = scalar_lea.hbm %s1372_s7, 16 }
  0x2f   : > { %v441_v25 = vld [vmem:[#allocation6 + $0x98] sm:$0xff]  ;;  %v438_v26 = vld [vmem:[#allocation6 + $0x80] sm:$0xff]  ;;  %v439_v27 = vld [vmem:[#allocation6 + $0x88] sm:$0xff]  ;;  %p1036_p1 = scmp.ne.s32.totalorder %s1034_s14, %s1035_s18  ;;  %p1040_p9 = scmp.lt.s32.totalorder %s1034_s14, %s1372_s7 }
  0x30   : > { %462 = vmatpush.msra.mxu0 %v448_v16  ;;  %482 = vmatpush.msra.mxu1 %v449_v17  ;;  %v436_v28 = vld [vmem:[#allocation6 + $0x70] sm:$0xff]  ;;  %v437_v29 = vld [vmem:[#allocation6 + $0x78] sm:$0xff]  ;;  %v434_v30 = vld [vmem:[#allocation6 + $0x60] sm:$0xff]  ;;  %p1041_p10 = scmp.lt.s32.totalorder %s1039_s23, %s1035_s18 }
  0x31   : > { %v922_v6 = vpop.eup %921  ;;  %v435_v31 = vld [vmem:[#allocation6 + $0x68] sm:$0xff]  ;;  %v432_v32 = vld [vmem:[#allocation6 + $0x50] sm:$0xff]  ;;  %v433_v33 = vld [vmem:[#allocation6 + $0x58] sm:$0xff]  ;;  %p1037_p3 = pnand %p1036_p1, %p1228_p0 }
  0x32   : > { %v386_v7 = vmul.f32 128.0, %v922_v6  ;;  %vm390_vm0 = vweird.f32 %v922_v6  ;;  %463 = vmatpush.msra.mxu0 %v446_v18  ;;  %483 = vmatpush.msra.mxu1 %v447_v19  ;;  %v430_v34 = vld [vmem:[#allocation6 + $0x40] sm:$0xff]  ;;  %v431_v35 = vld [vmem:[#allocation6 + $0x48] sm:$0xff]  ;;  %v428_v36 = vld [vmem:[#allocation6 + $0x30] sm:$0xff]  ;;  %p1042_p12 = por %p1041_p10, %p1040_p9 }
  0x33   : > { %v429_v37 = vld [vmem:[#allocation6 + $0x38] sm:$0xff]  ;;  %v426_v38 = vld [vmem:[#allocation6 + $0x20] sm:$0xff]  ;;  %v427_v39 = vld [vmem:[#allocation6 + $0x28] sm:$0xff]  ;;  %p1038_p8 = pneg %p1037_p3 }
  0x34   : > { %v387_v8 = vsub.f32 1.0, %v386_v7  ;;  %464 = vmatpush.msra.mxu0 %v444_v20  ;;  %484 = vmatpush.msra.mxu1 %v445_v21  ;;  %v424_v40 = vld [vmem:[#allocation6 + $0x10] sm:$0xff]  ;;  %v425_v41 = vld [vmem:[#allocation6 + $0x18] sm:$0xff]  ;;  %v422_v42 = vld [vmem:[#allocation6] sm:$0xff] }
  0x35   : > { %v423_v43 = vld [vmem:[#allocation6 + $0x8] sm:$0xff]  ;;  %v918_v53 = vld [vmem:[%s1366_s1] ss:$0 sm:$0xff]  ;;  %v603_v59 = vld [vmem:[#allocation8 + $0x78] sm:$0xff]  ;;  %p1043_p13 = pnand %p1042_p12, %p1038_p8 }
  0x36   : > { %v388_v9 = vmul.f32 %v922_v6, %v387_v8  ;;  %465 = vmatpush.msra.mxu0 %v442_v22  ;;  %485 = vmatpush.msra.mxu1 %v443_v23  ;;  %v919_v56 = vld [vmem:[%s1367_s2] ss:$0 sm:$0xff]  ;;  %v619_v60 = vld [vmem:[#allocation8 + $0xf8] sm:$0xff]  ;;  %v617_v1 = vld [vmem:[#allocation8 + $0xe8] sm:$0xff] }
  0x37   : > { %620 = vmatpush.msra.mxu2 %v603_v59  ;;  %640 = vmatpush.msra.mxu3 %v619_v60  ;;  %v602_v61 = vld [vmem:[#allocation8 + $0x70] sm:$0xff]  ;;  %v600_v2 = vld [vmem:[#allocation8 + $0x60] sm:$0xff]  ;;  %v615_v7 = vld [vmem:[#allocation8 + $0xd8] sm:$0xff] }
  0x38   : > { %v389_v10 = vadd.f32 %v922_v6, %v388_v9  ;;  %466 = vmatpush.msra.mxu0 %v440_v24  ;;  %486 = vmatpush.msra.mxu1 %v441_v25  ;;  %v618_v62 = vld [vmem:[#allocation8 + $0xf0] sm:$0xff]  ;;  %v616_v3 = vld [vmem:[#allocation8 + $0xe0] sm:$0xff]  ;;  %v595_v20 = vld [vmem:[#allocation8 + $0x38] sm:$0xff] }
  0x39   : > { %621 = vmatpush.msra.mxu2 %v602_v61  ;;  %641 = vmatpush.msra.mxu3 %v618_v62  ;;  %v454_v63 = vld [vmem:[%s1369_s4] sm:$0x3]  ;;  %v596_v16 = vld [vmem:[#allocation8 + $0x40] sm:$0xff]  ;;  %v611_v21 = vld [vmem:[#allocation8 + $0xb8] sm:$0xff] }
  0x3a   : > { %v1262_v11 = vsel %vm390_vm0, %v922_v6, %v389_v10  ;;  %467 = vmatpush.msra.mxu0 %v438_v26  ;;  %487 = vmatpush.msra.mxu1 %v439_v27  ;;  %v456_v4 = vperm.slane %v454_v63, 0  ;;  %v457_v5 = vperm.slane %v454_v63, 1  ;;  %v599_v6 = vld [vmem:[#allocation8 + $0x58] sm:$0xff]  ;;  %v598_v8 = vld [vmem:[#allocation8 + $0x50] sm:$0xff]  ;;  %v612_v17 = vld [vmem:[#allocation8 + $0xc0] sm:$0xff] }
  0x3b   : > { %642 = vmatpush.msra.mxu3 %v617_v1  ;;  %v614_v9 = vld [vmem:[#allocation8 + $0xd0] sm:$0xff] }
  0x3c   : > { %468 = vmatpush.msra.mxu0 %v436_v28  ;;  %488 = vmatpush.msra.mxu1 %v437_v29  ;;  %v594_v24 = vld [vmem:[#allocation8 + $0x30] sm:$0xff]  ;;  %v593_v28 = vld [vmem:[#allocation8 + $0x28] sm:$0xff] }
  0x3d   : > { %643 = vmatpush.msra.mxu3 %v616_v3  ;;  %v610_v25 = vld [vmem:[#allocation8 + $0xb0] sm:$0xff]  ;;  %v609_v29 = vld [vmem:[#allocation8 + $0xa8] sm:$0xff] }
  0x3e   : > { %469 = vmatpush.msra.mxu0 %v434_v30  ;;  %489 = vmatpush.msra.mxu1 %v435_v31 }
  0x3f   : > { %644 = vmatpush.msra.mxu3 %v615_v7 }
  0x40   : > { %470 = vmatpush.msra.mxu0 %v432_v32  ;;  %490 = vmatpush.msra.mxu1 %v433_v33  ;;  %v592_v33 = vld [vmem:[#allocation8 + $0x20] sm:$0xff] }
  0x41   : > { %645 = vmatpush.msra.mxu3 %v614_v9 }
  0x42   : > { %471 = vmatpush.msra.mxu0 %v430_v34  ;;  %491 = vmatpush.msra.mxu1 %v431_v35  ;;  %v608_v34 = vld [vmem:[#allocation8 + $0xa0] sm:$0xff] }
  0x44   : > { %472 = vmatpush.msra.mxu0 %v428_v36  ;;  %492 = vmatpush.msra.mxu1 %v429_v37 }
  0x46   : > { %473 = vmatpush.msra.mxu0 %v426_v38  ;;  %493 = vmatpush.msra.mxu1 %v427_v39  ;;  %v591_v39 = vld [vmem:[#allocation8 + $0x18] sm:$0xff] }
  0x48   : > { %474 = vmatpush.msra.mxu0 %v424_v40  ;;  %494 = vmatpush.msra.mxu1 %v425_v41  ;;  %v607_v40 = vld [vmem:[#allocation8 + $0x98] sm:$0xff] }
  0x4a   : > { %475 = vmatpush.msra.mxu0 %v422_v42  ;;  %495 = vmatpush.msra.mxu1 %v423_v43 }
  0x9e   : > { %v384_v12 = vpop.xlane.xlu0 %383 }
  0x9f   : > { %v392_v13 = vmul.f32 %v1262_v11, %v384_v12  ;;  %v597_v12 = vld [vmem:[#allocation8 + $0x48] sm:$0xff] }
  0xa1   : > { %v1265_v14 = vsub.f32 %v382_v0, %v392_v13  ;;  %v601_v0 = vld [vmem:[#allocation8 + $0x68] sm:$0xff] }
  0xa2   : > { %622 = vmatpush.msra.mxu2 %v601_v0  ;;  %v613_v13 = vld [vmem:[#allocation8 + $0xc8] sm:$0xff] }
  0xa3   : > { %v394_v15 = vmul.f32 %v1265_v14, %v1265_v14  ;;  %646 = vmatpush.msra.mxu3 %v613_v13 }
  0xa4   : > { %623 = vmatpush.msra.mxu2 %v600_v2 }
  0xa5   : > { %395 = vadd.xlane.f32.xlu0 %v394_v15  ;;  %647 = vmatpush.msra.mxu3 %v612_v17 }
  0xa6   : > { %624 = vmatpush.msra.mxu2 %v599_v6 }
  0xa7   : > { %648 = vmatpush.msra.mxu3 %v611_v21 }
  0xa8   : > { %625 = vmatpush.msra.mxu2 %v598_v8 }
  0xa9   : > { %649 = vmatpush.msra.mxu3 %v610_v25 }
  0xaa   : > { %626 = vmatpush.msra.mxu2 %v597_v12 }
  0xab   : > { %650 = vmatpush.msra.mxu3 %v609_v29 }
  0xac   : > { %627 = vmatpush.msra.mxu2 %v596_v16 }
  0xad   : > { %651 = vmatpush.msra.mxu3 %v608_v34 }
  0xae   : > { %628 = vmatpush.msra.mxu2 %v595_v20 }
  0xaf   : > { %652 = vmatpush.msra.mxu3 %v607_v40 }
  0xb0   : > { %629 = vmatpush.msra.mxu2 %v594_v24 }
  0xb2   : > { %630 = vmatpush.msra.mxu2 %v593_v28 }
  0xb4   : > { %631 = vmatpush.msra.mxu2 %v592_v33 }
  0xb6   : > { %632 = vmatpush.msra.mxu2 %v591_v39 }
 0x118   : > { %v396_v44 = vpop.xlane.xlu0 %395 }
 0x119   : > { %v397_v45 = vmul.f32 %v396_v44, %v1262_v11 }
 0x11b   : > { %v398_v46 = vadd.f32 1e-05, %v397_v45  ;;  %v590_v45 = vld [vmem:[#allocation8 + $0x10] sm:$0xff] }
 0x11c   : > { %633 = vmatpush.msra.mxu2 %v590_v45 }
 0x11d   : > { %923 = vrsqrt.f32 %v398_v46  ;;  %vm405_vm2 = vweird.f32 %v398_v46 }
 0x123   : > { %v924_v47 = vpop.eup %923 }
 0x124   : > { %v400_v48 = vmul.f32 %v924_v47, %v398_v46  ;;  %vm406_vm1 = vweird.f32 %v924_v47  ;;  %v606_v46 = vld [vmem:[#allocation8 + $0x90] sm:$0xff] }
 0x125   : > { %vm407_vm3 = vmor %vm405_vm2, %vm406_vm1  ;;  %653 = vmatpush.msra.mxu3 %v606_v46 }
 0x126   : > { %v401_v49 = vmul.f32 %v924_v47, %v400_v48 }
 0x128   : > { %v402_v50 = vmul.f32 0.5, %v401_v49 }
 0x12a   : > { %v403_v51 = vsub.f32 1.5, %v402_v50  ;;  %v589_v50 = vld [vmem:[#allocation8 + $0x8] sm:$0xff] }
 0x12b   : > { %634 = vmatpush.msra.mxu2 %v589_v50 }
 0x12c   : > { %v404_v52 = vmul.f32 %v924_v47, %v403_v51  ;;  %v605_v51 = vld [vmem:[#allocation8 + $0x88] sm:$0xff] }
 0x12d   : > { %654 = vmatpush.msra.mxu3 %v605_v51 }
 0x12e   : > { %v408_v54 = vsel %vm407_vm3, %v924_v47, %v404_v52 }
 0x12f   : > { %v409_v55 = vmul.f32 %v408_v54, %v1265_v14 }
 0x131   : > { %v414_v57 = vmul.f32 %v918_v53, %v409_v55  ;;  %v588_v55 = vld [vmem:[#allocation8] sm:$0xff] }
 0x132   : > { %635 = vmatpush.msra.mxu2 %v588_v55 }
 0x133   : > { %v419_v58 = vadd.f32 %v919_v56, %v414_v57  ;;  %v604_v56 = vld [vmem:[#allocation8 + $0x80] sm:$0xff] }
 0x134   : > { %655 = vmatpush.msra.mxu3 %v604_v56 }
 0x135   : > { %476 = vmatmul.f32.vlgmr.msra.gmra.mxu0 %v419_v58  ;;  %496 = vmatmul.f32.vlgmr.msra.gmra.mxu1 %v419_v58 }
 0x1b2   : > { %v477_v10 = vpop.f32.mrf.mxu0  ;;  %v497_v11 = vpop.f32.mrf.mxu1 }
 0x1b3   : > { %v1280_v14 = vadd.f32 %v477_v10, %v456_v4  ;;  %v1282_v15 = vadd.f32 %v497_v11, %v457_v5 }
 0x1b5   : > { %v1285_v18 = vmul.f32 0.70710677, %v1280_v14  ;;  %v1288_v19 = vmul.f32 0.70710677, %v1282_v15  ;;  %v500_v46 = vmul.f32 0.5, %v1280_v14 }
 0x1b6   : > { %v920_v14 = vld [vmem:[%s1371_s6] ss:$0 sm:$0xff] }
 0x1b7   : > { %v504_v22 = vmul.f32 %v1285_v18, %v1285_v18  ;;  %v544_v23 = vmul.f32 %v1288_v19, %v1288_v19 }
 0x1b9   : > { %v1294_v26 = vmin.f32 %v504_v22, 16.0  ;;  %v1296_v27 = vmin.f32 %v544_v23, 16.0 }
 0x1bb   : > { %v506_v30 = vmul.f32 2.1237322e-06, %v1294_v26  ;;  %v546_v31 = vmul.f32 2.1237322e-06, %v1296_v27  ;;  %v517_v32 = vmul.f32 3.8918573e-05, %v1294_v26 }
 0x1bc   : > { %v557_v35 = vmul.f32 3.8918573e-05, %v1296_v27 }
 0x1bd   : > { %v507_v36 = vadd.f32 0.00028619796, %v506_v30  ;;  %v547_v37 = vadd.f32 0.00028619796, %v546_v31  ;;  %v518_v38 = vadd.f32 0.001143296, %v517_v32 }
 0x1be   : > { %v558_v41 = vadd.f32 0.001143296, %v557_v35 }
 0x1bf   : > { %v508_v42 = vmul.f32 %v507_v36, %v1294_v26  ;;  %v548_v43 = vmul.f32 %v547_v37, %v1296_v27  ;;  %v519_v44 = vmul.f32 %v518_v38, %v1294_v26 }
 0x1c0   : > { %v559_v47 = vmul.f32 %v558_v41, %v1296_v27 }
 0x1c1   : > { %v509_v48 = vadd.f32 0.0036580483, %v508_v42  ;;  %v520_v49 = vadd.f32 0.014752088, %v519_v44  ;;  %v549_v53 = vadd.f32 0.0036580483, %v548_v43 }
 0x1c2   : > { %v560_v52 = vadd.f32 0.014752088, %v559_v47 }
 0x1c3   : > { %v521_v54 = vmul.f32 %v520_v49, %v1294_v26  ;;  %v510_v58 = vmul.f32 %v509_v48, %v1294_v26  ;;  %v550_v61 = vmul.f32 %v549_v53, %v1296_v27 }
 0x1c4   : > { %v561_v57 = vmul.f32 %v560_v52, %v1296_v27 }
 0x1c5   : > { %v522_v59 = vadd.f32 0.112945676, %v521_v54  ;;  %v511_v0 = vadd.f32 0.05243302, %v510_v58  ;;  %v551_v3 = vadd.f32 0.05243302, %v550_v61 }
 0x1c6   : > { %v562_v60 = vadd.f32 0.112945676, %v561_v57 }
 0x1c7   : > { %v523_v62 = vmul.f32 %v522_v59, %v1294_v26  ;;  %v512_v6 = vmul.f32 %v511_v0, %v1294_v26  ;;  %v552_v9 = vmul.f32 %v551_v3, %v1296_v27 }
 0x1c8   : > { %v563_v63 = vmul.f32 %v562_v60, %v1296_v27 }
 0x1c9   : > { %v524_v1 = vadd.f32 0.4994258, %v523_v62  ;;  %v513_v10 = vadd.f32 0.18741608, %v512_v6  ;;  %v553_v11 = vadd.f32 0.18741608, %v552_v9 }
 0x1ca   : > { %v564_v2 = vadd.f32 0.4994258, %v563_v63 }
 0x1cb   : > { %v525_v4 = vmul.f32 %v524_v1, %v1294_v26  ;;  %v514_v13 = vmul.f32 %v513_v10, %v1294_v26  ;;  %v554_v20 = vmul.f32 %v553_v11, %v1296_v27 }
 0x1cc   : > { %v565_v5 = vmul.f32 %v564_v2, %v1296_v27 }
 0x1cd   : > { %v526_v7 = vadd.f32 1.0, %v525_v4  ;;  %v515_v23 = vadd.f32 1.1283791, %v514_v13  ;;  %v555_v31 = vadd.f32 1.1283791, %v554_v20 }
 0x1ce   : > { %v566_v8 = vadd.f32 1.0, %v565_v5 }
 0x1cf   : > { %925 = vrcp.f32 %v526_v7  ;;  %v538_v24 = vand.u32 2147483648, %v526_v7  ;;  %v536_v29 = vand.u32 2147483647, %v526_v7  ;;  %vm532_vm6 = vweird.f32 %v526_v7 }
 0x1d0   : > { %927 = vrcp.f32 %v566_v8  ;;  %v578_v30 = vand.u32 2147483648, %v566_v8  ;;  %v576_v33 = vand.u32 2147483647, %v566_v8  ;;  %vm572_vm8 = vweird.f32 %v566_v8 }
 0x1d1   : > { %v539_v26 = vor.u32 1.1754944e-38, %v538_v24  ;;  %v516_v27 = vmul.f32 %v515_v23, %v1285_v18  ;;  %vm537_vm9 = vcmp.eq.f32.partialorder %v536_v29, 8.507059e+37  ;;  %v556_v38 = vmul.f32 %v555_v31, %v1288_v19 }
 0x1d2   : > { %v579_v37 = vor.u32 1.1754944e-38, %v578_v30  ;;  %vm577_vm11 = vcmp.eq.f32.partialorder %v576_v33, 8.507059e+37  ;;  %v501_v18 = vmul.f32 0.5, %v1282_v15 }
 0x1d5   : > { %v926_v12 = vpop.eup %925 }
 0x1d6   : > { %v928_v16 = vpop.eup %927  ;;  %v528_v17 = vmul.f32 %v926_v12, %v526_v7  ;;  %vm533_vm4 = vweird.f32 %v926_v12 }
 0x1d7   : > { %v568_v21 = vmul.f32 %v928_v16, %v566_v8  ;;  %vm573_vm5 = vweird.f32 %v928_v16  ;;  %vm534_vm7 = vmor %vm532_vm6, %vm533_vm4 }
 0x1d8   : > { %v529_v22 = vsub.f32 1.0, %v528_v17  ;;  %vm574_vm10 = vmor %vm572_vm8, %vm573_vm5 }
 0x1d9   : > { %v569_v25 = vsub.f32 1.0, %v568_v21 }
 0x1da   : > { %v530_v28 = vmul.f32 %v926_v12, %v529_v22 }
 0x1db   : > { %v570_v32 = vmul.f32 %v928_v16, %v569_v25 }
 0x1dc   : > { %v531_v34 = vadd.f32 %v926_v12, %v530_v28 }
 0x1dd   : > { %v571_v35 = vadd.f32 %v928_v16, %v570_v32 }
 0x1de   : > { %v535_v36 = vsel %vm534_vm7, %v926_v12, %v531_v34 }
 0x1df   : > { %v540_v39 = vsel %vm537_vm9, %v539_v26, %v535_v36  ;;  %v575_v40 = vsel %vm574_vm10, %v928_v16, %v571_v35 }
 0x1e0   : > { %v541_v41 = vmul.f32 %v540_v39, %v516_v27  ;;  %v580_v42 = vsel %vm577_vm11, %v579_v37, %v575_v40 }
 0x1e1   : > { %v581_v43 = vmul.f32 %v580_v42, %v556_v38 }
 0x1e2   : > { %v824_v44 = vclamps-f32 %v541_v41, 1.0 }
 0x1e3   : > { %v825_v45 = vclamps-f32 %v581_v43, 1.0 }
 0x1e4   : > { %v584_v47 = vadd.f32 1.0, %v824_v44 }
 0x1e5   : > { %v585_v48 = vadd.f32 1.0, %v825_v45 }
 0x1e6   : > { %v586_v49 = vmul.f32 %v584_v47, %v500_v46 }
 0x1e7   : > { %v587_v50 = vmul.f32 %v585_v48, %v501_v18 }
 0x1e8   : > { %636 = vmatmul.f32.vlgmr.msra.gmra.mxu2 %v586_v49 }
 0x1e9   : > { %656 = vmatmul.f32.vlgmr.msra.gmra.mxu3 %v587_v50 }
 0x26b   : > { %v637_v19 = vpop.f32.mrf.mxu2 }
 0x26c   : > { %v657_v51 = vpop.f32.mrf.mxu3 }
 0x26d   : > { %v658_v15 = vadd.f32 %v657_v51, %v637_v19 }
 0x26f   : > { %v679_v52 = vadd.f32 %v920_v14, %v658_v15 }
 0x271   : > { %680 = vst [vmem:[%s370_s3] sm:$0xff] %v679_v52 }
 0x272   : > { %1046 = shalt.err (!%p1043_p13)
}
 0x273   : > { %840 = dma.vmem_to_hbm [thread:$0]  (%p1228_p0), %s695_s8, 128, %s697_s12, %s682_s27  }
 0x274 PF: > { %s708_s13 = sand.u32 1, %s1085_s24   ;;  %p854_p2 = pnand %p816_p6, %p1235_p5 }
 0x275   : > { %s709_s10 = scalar_lea.sflag [#allocation5], %s708_s13 }
 0x276   : > { %p855_p4 = pneg %p854_p2 }
 0x278   : > { %1080 = dma.done.wait (%p855_p4), %s709_s10, 128  }
 0x279   : > { %1082 = vsyncadd (%p855_p4), %s709_s10, 4294967168  ;;  %s24_s29 = sadd.s32 1, %s1105_s29   ;;  %s1380_s24 = smov %s1089_s25 }
 0x27a   : > { %p21_p7 = scmp.ge.s32.totalorder %s24_s29, 4   ;;  %s1381_s25 = smov %s1093_s26 }
 0x27b   : > { %s1382_s26 = smov %s1233_s16  ;;  %s1383_s27 = smov %s1101_s28 }
 0x27c   : > { %s1384_s28 = smov %s1386_s9  ;;  %23 = sbr.rel (!%p21_p7) target bundleno = 9 (0x9), region = 122 }
 0x281   :  { %715 = vsyncpa [#allocation4], 1 }
 0x282   :  { %717 = vsyncpa [#allocation4 + $0x1], 1 }
 0x283   :  { %718 = vsyncpa [#allocation7], 1 }
 0x284   :  { %719 = vsyncpa [#allocation5], 1 }
 0x285   :  { %721 = vsyncpa [#allocation5 + $0x1], 1 }

</bundles_post_ra>
